<compile_context>
chip_gen: v7x
topology: tpu7x:2x2x1
jax: 0.10.0
libtpu: 0.0.40
codegen_flags: <defaults>
</compile_context>

<pallas_src>
import jax
import jax.numpy as jnp
from jax.experimental import pallas as pl
from jax.experimental.pallas import tpu as pltpu


def _round_up(x, m):
    return (x + m - 1) // m * m


def _pick_tile(total, max_tile, unit):
    """Pick (tile, padded_total): tile is a multiple of `unit`, <= max_tile.

    Prefers >= 2 grid steps when the padded extent allows it, so that
    dimension_semantics=("parallel",) can shard the grid across both
    TensorCores on v7x; steps are balanced so the tail tile is not mostly pad.
    """
    max_tile = _round_up(max_tile, unit)
    tp = _round_up(max(total, 1), unit)
    min_steps = 2 if tp >= 2 * unit else 1
    steps = max(-(-tp // max_tile), min_steps)
    tile = _round_up(-(-tp // steps), unit)
    return tile, tile * steps


# ----------------------------------------------------------------------------
# Pallas kernels
# ----------------------------------------------------------------------------
def _conv_sig_pool_kernel(p_ref, w_ref, b_ref, o_ref):
    """Fused conv(as matmul) + 2x2 max-pool + bias + sigmoid.

    p_ref: (4, Kp, TILE_M) bf16  -- im2col patches, one plane per pool tap
    w_ref: (C_out, Kp)     bf16
    b_ref: (C_out, 1)      f32
    o_ref: (C_out, TILE_M) bf16  -- pooled activations, lane-dense over M

    Bias + sigmoid are applied once, AFTER the max over the 4 pool taps.
    Exact because sigmoid is strictly monotone increasing.
    """
    w = w_ref[...]
    acc = jnp.dot(w, p_ref[0], preferred_element_type=jnp.float32)
    for t in range(1, 4):          # static unroll: 3 more MXU matmuls + max
        acc = jnp.maximum(
            acc, jnp.dot(w, p_ref[t], preferred_element_type=jnp.float32))
    z = acc + b_ref[...]           # single (C_out,1)->(C_out,TILE_M) broadcast
    # sigmoid(z) = 1 / (1 + exp(-z)); approx reciprocal runs on the EUP slot,
    # keeping the divide off the VALU. Error << bf16 output quantization.
    sig = pl.reciprocal(1.0 + jnp.exp(-z), approx=True)
    o_ref[...] = sig.astype(o_ref.dtype)


def _fc_fused_kernel(x_ref, w1_ref, b1_ref, w2_ref, b2_ref, w3_ref, b3_ref,
                     o_ref):
    """Fused fc1 -> tanh -> fc2 -> tanh -> fc3 (single launch, no HBM hops).

    x_ref:  (TILE_N, K)   bf16
    w*_ref: (in_p, 128)   bf16 (zero-padded output dims; tanh(0)=0 keeps
                                padded lanes inert through the chain)
    b*_ref: (1, 128)      f32
    o_ref:  (TILE_N, 128) f32
    """
    h = jnp.dot(x_ref[...], w1_ref[...], preferred_element_type=jnp.float32)
    h = jnp.tanh(h + b1_ref[...]).astype(w2_ref.dtype)
    h = jnp.dot(h, w2_ref[...], preferred_element_type=jnp.float32)
    h = jnp.tanh(h + b2_ref[...]).astype(w3_ref.dtype)
    o = jnp.dot(h, w3_ref[...], preferred_element_type=jnp.float32)
    o_ref[...] = (o + b3_ref[...]).astype(o_ref.dtype)


# ----------------------------------------------------------------------------
# Wrappers (glue)
# ----------------------------------------------------------------------------
def _pool_tap_patches(y, kh, kw):
    """y: (C, N, H, W) -> taps: (4, C*kh*kw, N*POH*POW), plus (POH, POW).

    taps[t] holds the im2col patches of the conv-output pixels belonging to
    pool tap t of the 2x2 window, so max over t == maxpool(conv). Feature
    order along K is (c, kh, kw), matching PyTorch's weight.reshape.
    """
    C, N, H, W = y.shape
    OH, OW = H - kh + 1, W - kw + 1
    POH, POW = OH // 2, OW // 2
    cols = [y[:, :, i:i + OH, j:j + OW] for i in range(kh) for j in range(kw)]
    p = jnp.stack(cols, axis=1).reshape(C * kh * kw, N, OH, OW)
    p = p[:, :, :2 * POH, :2 * POW]        # floor semantics of MaxPool2d(2,2)
    taps = [p[:, :, 0::2, 0::2], p[:, :, 0::2, 1::2],
            p[:, :, 1::2, 0::2], p[:, :, 1::2, 1::2]]
    taps = jnp.stack([t.reshape(C * kh * kw, N * POH * POW) for t in taps], 0)
    return taps, POH, POW


def conv_sigmoid_pool(y, w, b, *, padding=0, tile_m=2048):
    """PyTorch Conv2d (zero pad) -> sigmoid -> MaxPool2d(2,2), fused.

    y: (C_in, N, H, W) channel-first activations
    w: (C_out, C_in, kh, kw) PyTorch conv weight
    returns (C_out, N, POH, POW) bf16
    """
    c_out, c_in, kh, kw = w.shape
    assert y.shape[0] == c_in
    N = y.shape[1]
    # Cast BEFORE patch extraction: the im2col taps (dominant HBM traffic of
    # the conv stage) are built / written / read in bf16, never in f32.
    y = y.astype(jnp.bfloat16)
    if padding:
        y = jnp.pad(y, ((0, 0), (0, 0), (padding, padding), (padding, padding)))
    taps, POH, POW = _pool_tap_patches(y, kh, kw)
    K, M = taps.shape[1], taps.shape[2]

    Kp = _round_up(K, 16)                        # bf16 sublane packing
    TILE_M, Mp = _pick_tile(M, tile_m, 128)      # lane-dense, >=2 steps if poss.

    taps = jnp.pad(taps, ((0, 0), (0, Kp - K), (0, Mp - M)))   # stays bf16
    wm = jnp.pad(w.reshape(c_out, K), ((0, 0), (0, Kp - K))).astype(jnp.bfloat16)
    b2 = b.reshape(c_out, 1).astype(jnp.float32)

    out = pl.pallas_call(
        _conv_sig_pool_kernel,
        out_shape=jax.ShapeDtypeStruct((c_out, Mp), jnp.bfloat16),
        grid_spec=pltpu.PrefetchScalarGridSpec(
            num_scalar_prefetch=0,
            grid=(Mp // TILE_M,),
            in_specs=[
                pl.BlockSpec((4, Kp, TILE_M), lambda i: (0, 0, i)),
                pl.BlockSpec((c_out, Kp), lambda i: (0, 0)),   # weights resident
                pl.BlockSpec((c_out, 1), lambda i: (0, 0)),
            ],
            out_specs=pl.BlockSpec((c_out, TILE_M), lambda i: (0, i)),
        ),
        compiler_params=pltpu.CompilerParams(
            dimension_semantics=("parallel",)),
    )(taps, wm, b2)
    return out[:, :M].reshape(c_out, N, POH, POW)


def fc_head(x, w1, b1, w2, b2, w3, b3, *, tile_n=1024):
    """Fused fc1->tanh->fc2->tanh->fc3.  x: (N, 400) -> (N, 10) f32."""
    N, K = x.shape
    d3 = w3.shape[1]
    P = 128  # padded lane width for the 120 / 84 / 10 output dims

    def pad2(a, r, c):
        return jnp.pad(a, ((0, r - a.shape[0]), (0, c - a.shape[1])))

    TILE_N, Np = _pick_tile(N, tile_n, 16)   # bf16 packs 16 rows per vreg

    xp = jnp.pad(x, ((0, Np - N), (0, 0))).astype(jnp.bfloat16)
    w1p = pad2(w1, K, P).astype(jnp.bfloat16)
    w2p = pad2(w2, P, P).astype(jnp.bfloat16)
    w3p = pad2(w3, P, P).astype(jnp.bfloat16)
    b1p = pad2(b1.reshape(1, -1), 1, P).astype(jnp.float32)
    b2p = pad2(b2.reshape(1, -1), 1, P).astype(jnp.float32)
    b3p = pad2(b3.reshape(1, -1), 1, P).astype(jnp.float32)

    out = pl.pallas_call(
        _fc_fused_kernel,
        out_shape=jax.ShapeDtypeStruct((Np, P), jnp.float32),
        grid_spec=pltpu.PrefetchScalarGridSpec(
            num_scalar_prefetch=0,
            grid=(Np // TILE_N,),
            in_specs=[
                pl.BlockSpec((TILE_N, K), lambda i: (i, 0)),
                pl.BlockSpec((K, P), lambda i: (0, 0)),
                pl.BlockSpec((1, P), lambda i: (0, 0)),
                pl.BlockSpec((P, P), lambda i: (0, 0)),
                pl.BlockSpec((1, P), lambda i: (0, 0)),
                pl.BlockSpec((P, P), lambda i: (0, 0)),
                pl.BlockSpec((1, P), lambda i: (0, 0)),
            ],
            out_specs=pl.BlockSpec((TILE_N, P), lambda i: (i, 0)),
        ),
        compiler_params=pltpu.CompilerParams(
            dimension_semantics=("parallel",)),
    )(xp, w1p, b1p, w2p, b2p, w3p, b3p)
    return out[:N, :d3]


# ----------------------------------------------------------------------------
# LeNet5 parameters + forward
# ----------------------------------------------------------------------------
def init_params(key):
    ks = jax.random.split(key, 10)

    def u(k, shape, fan_in):
        bound = 1.0 / jnp.sqrt(jnp.float32(fan_in))
        return jax.random.uniform(k, shape, jnp.float32, -bound, bound)

    return {
        "conv1_w": u(ks[0], (6, 1, 5, 5), 1 * 5 * 5),
        "conv1_b": u(ks[1], (6,), 1 * 5 * 5),
        "conv2_w": u(ks[2], (16, 6, 5, 5), 6 * 5 * 5),
        "conv2_b": u(ks[3], (16,), 6 * 5 * 5),
        # FC weights stored pre-transposed as (in, out) -- no per-step .T.
        "fc1_w": u(ks[4], (400, 120), 400),
        "fc1_b": u(ks[5], (120,), 400),
        "fc2_w": u(ks[6], (120, 84), 120),
        "fc2_b": u(ks[7], (84,), 120),
        "fc3_w": u(ks[8], (84, 10), 84),
        "fc3_b": u(ks[9], (10,), 84),
    }


def lenet5_forward(params, x):
    # x: (N, 1, 28, 28) float32, NCHW like the PyTorch module.
    N = x.shape[0]
    y = jnp.transpose(x, (1, 0, 2, 3))                        # (1, N, 28, 28)
    y = conv_sigmoid_pool(y, params["conv1_w"], params["conv1_b"],
                          padding=2)                          # (6, N, 14, 14)
    y = conv_sigmoid_pool(y, params["conv2_w"], params["conv2_b"],
                          padding=0)                          # (16, N, 5, 5)
    # torch.flatten(x, 1): (N, C*H*W) with (c, h, w) ordering.
    feat = jnp.transpose(y, (1, 0, 2, 3)).reshape(N, 16 * 5 * 5)
    return fc_head(feat,
                   params["fc1_w"], params["fc1_b"],
                   params["fc2_w"], params["fc2_b"],
                   params["fc3_w"], params["fc3_b"])          # (N, 10) f32


if __name__ == "__main__":
    key = jax.random.PRNGKey(0)
    pkey, xkey = jax.random.split(key)
    params = init_params(pkey)
    # LeNet5's fc1 (16*5*5 inputs) fixes the input to 1x28x28.
    x = jax.random.normal(xkey, (2, 1, 28, 28), dtype=jnp.float32)

    out = jax.jit(lenet5_forward)(params, x)
    out = jax.block_until_ready(out)
    assert out.shape == (2, 10) and out.dtype == jnp.float32
    print("KERNEL_OK")
</pallas_src>

<mosaic_0001>
module attributes {stable_mosaic.version = 11 : i64} {
  func.func @_conv_sig_pool_kernel(%arg0: i32, %arg1: memref<4x32x256xbf16, #tpu.memory_space<vmem>>, %arg2: memref<6x32xbf16, #tpu.memory_space<vmem>>, %arg3: memref<6x1xf32, #tpu.memory_space<vmem>>, %arg4: memref<6x256xbf16, #tpu.memory_space<vmem>>) attributes {dimension_semantics = [#tpu.dimension_semantics<parallel>], iteration_bounds = array<i64: 2>, scalar_prefetch = 0 : i64, scratch_operands = 0 : i64, tpu.core_type = #tpu.core_type<tc>, window_params = [{transform_indices = @transform_0, window_bounds = array<i64: 4, 32, 256>}, {pipeline_mode = #tpu.pipeline_mode<synchronous>, transform_indices = @transform_1, window_bounds = array<i64: 6, 32>}, {pipeline_mode = #tpu.pipeline_mode<synchronous>, transform_indices = @transform_2, window_bounds = array<i64: 6, 1>}, {transform_indices = @transform_3, window_bounds = array<i64: 6, 256>}]} {
    %c0 = arith.constant 0 : index
    %c0_0 = arith.constant 0 : index
    %0 = vector.load %arg2[%c0, %c0_0] : memref<6x32xbf16, #tpu.memory_space<vmem>>, vector<6x32xbf16>
    %c0_1 = arith.constant 0 : index
    %c0_2 = arith.constant 0 : index
    %c0_3 = arith.constant 0 : index
    %1 = vector.load %arg1[%c0_1, %c0_2, %c0_3] : memref<4x32x256xbf16, #tpu.memory_space<vmem>>, vector<1x32x256xbf16>
    %2 = vector.shape_cast %1 : vector<1x32x256xbf16> to vector<32x256xbf16>
    %cst = arith.constant dense<0.000000e+00> : vector<6x256xf32>
    %3 = tpu.matmul %0, %2, %cst {dimension_numbers = #tpu.dot_dimension_numbers<[1], [0], [0], [1], [0, 0, 1, 1], [], []>} : vector<6x32xbf16>, vector<32x256xbf16>, vector<6x256xf32> -> vector<6x256xf32>
    %c1 = arith.constant 1 : index
    %c0_4 = arith.constant 0 : index
    %c0_5 = arith.constant 0 : index
    %4 = vector.load %arg1[%c1, %c0_4, %c0_5] : memref<4x32x256xbf16, #tpu.memory_space<vmem>>, vector<1x32x256xbf16>
    %5 = vector.shape_cast %4 : vector<1x32x256xbf16> to vector<32x256xbf16>
    %cst_6 = arith.constant dense<0.000000e+00> : vector<6x256xf32>
    %6 = tpu.matmul %0, %5, %cst_6 {dimension_numbers = #tpu.dot_dimension_numbers<[1], [0], [0], [1], [0, 0, 1, 1], [], []>} : vector<6x32xbf16>, vector<32x256xbf16>, vector<6x256xf32> -> vector<6x256xf32>
    %7 = arith.maximumf %3, %6 : vector<6x256xf32>
    %c2 = arith.constant 2 : index
    %c0_7 = arith.constant 0 : index
    %c0_8 = arith.constant 0 : index
    %8 = vector.load %arg1[%c2, %c0_7, %c0_8] : memref<4x32x256xbf16, #tpu.memory_space<vmem>>, vector<1x32x256xbf16>
    %9 = vector.shape_cast %8 : vector<1x32x256xbf16> to vector<32x256xbf16>
    %cst_9 = arith.constant dense<0.000000e+00> : vector<6x256xf32>
    %10 = tpu.matmul %0, %9, %cst_9 {dimension_numbers = #tpu.dot_dimension_numbers<[1], [0], [0], [1], [0, 0, 1, 1], [], []>} : vector<6x32xbf16>, vector<32x256xbf16>, vector<6x256xf32> -> vector<6x256xf32>
    %11 = arith.maximumf %7, %10 : vector<6x256xf32>
    %c3 = arith.constant 3 : index
    %c0_10 = arith.constant 0 : index
    %c0_11 = arith.constant 0 : index
    %12 = vector.load %arg1[%c3, %c0_10, %c0_11] : memref<4x32x256xbf16, #tpu.memory_space<vmem>>, vector<1x32x256xbf16>
    %13 = vector.shape_cast %12 : vector<1x32x256xbf16> to vector<32x256xbf16>
    %cst_12 = arith.constant dense<0.000000e+00> : vector<6x256xf32>
    %14 = tpu.matmul %0, %13, %cst_12 {dimension_numbers = #tpu.dot_dimension_numbers<[1], [0], [0], [1], [0, 0, 1, 1], [], []>} : vector<6x32xbf16>, vector<32x256xbf16>, vector<6x256xf32> -> vector<6x256xf32>
    %15 = arith.maximumf %11, %14 : vector<6x256xf32>
    %c0_13 = arith.constant 0 : index
    %c0_14 = arith.constant 0 : index
    %16 = vector.load %arg3[%c0_13, %c0_14] : memref<6x1xf32, #tpu.memory_space<vmem>>, vector<6x1xf32>
    %17 = vector.broadcast %16 : vector<6x1xf32> to vector<6x256xf32>
    %18 = arith.addf %15, %17 : vector<6x256xf32>
    %cst_15 = arith.constant 0.000000e+00 : f32
    %19 = vector.broadcast %cst_15 : f32 to vector<6x256xf32>
    %20 = arith.subf %19, %18 : vector<6x256xf32>
    %21 = math.exp %20 : vector<6x256xf32>
    %cst_16 = arith.constant 1.000000e+00 : f32
    %22 = vector.broadcast %cst_16 : f32 to vector<6x256xf32>
    %23 = arith.addf %22, %21 : vector<6x256xf32>
    %24 = tpu.reciprocal %23 {approx = true} : vector<6x256xf32> -> vector<6x256xf32>
    %25 = arith.truncf %24 : vector<6x256xf32> to vector<6x256xbf16>
    %c0_17 = arith.constant 0 : index
    %c0_18 = arith.constant 0 : index
    %26 = vector.load %arg4[%c0_17, %c0_18] : memref<6x256xbf16, #tpu.memory_space<vmem>>, vector<6x256xbf16>
    tpu.vector_store %arg4[%c0_17, %c0_18], %25 {strides = array<i32>} : memref<6x256xbf16, #tpu.memory_space<vmem>>, vector<6x256xbf16>,
    return
  }
  func.func @transform_0(%arg0: i32) -> (i32, i32, i32) {
    %c0_i32 = arith.constant 0 : i32
    %c0_i32_0 = arith.constant 0 : i32
    %c0_i32_1 = arith.constant 0 : i32
    return %c0_i32, %c0_i32_0, %arg0 : i32, i32, i32
  }
  func.func @transform_1(%arg0: i32) -> (i32, i32) {
    %c0_i32 = arith.constant 0 : i32
    %c0_i32_0 = arith.constant 0 : i32
    %c0_i32_1 = arith.constant 0 : i32
    return %c0_i32, %c0_i32_0 : i32, i32
  }
  func.func @transform_2(%arg0: i32) -> (i32, i32) {
    %c0_i32 = arith.constant 0 : i32
    %c0_i32_0 = arith.constant 0 : i32
    %c0_i32_1 = arith.constant 0 : i32
    return %c0_i32, %c0_i32_0 : i32, i32
  }
  func.func @transform_3(%arg0: i32) -> (i32, i32) {
    %c0_i32 = arith.constant 0 : i32
    %c0_i32_0 = arith.constant 0 : i32
    return %c0_i32, %arg0 : i32, i32
  }
}

module attributes {stable_mosaic.version = 11 : i64} {
  func.func @_conv_sig_pool_kernel(%arg0: i32, %arg1: memref<4x160x128xbf16, #tpu.memory_space<vmem>>, %arg2: memref<16x160xbf16, #tpu.memory_space<vmem>>, %arg3: memref<16x1xf32, #tpu.memory_space<vmem>>, %arg4: memref<16x128xbf16, #tpu.memory_space<vmem>>) attributes {dimension_semantics = [#tpu.dimension_semantics<parallel>], iteration_bounds = array<i64: 1>, scalar_prefetch = 0 : i64, scratch_operands = 0 : i64, tpu.core_type = #tpu.core_type<tc>, window_params = [{transform_indices = @transform_0, window_bounds = array<i64: 4, 160, 128>}, {pipeline_mode = #tpu.pipeline_mode<synchronous>, transform_indices = @transform_1, window_bounds = array<i64: 16, 160>}, {pipeline_mode = #tpu.pipeline_mode<synchronous>, transform_indices = @transform_2, window_bounds = array<i64: 16, 1>}, {transform_indices = @transform_3, window_bounds = array<i64: 16, 128>}]} {
    %c0 = arith.constant 0 : index
    %c0_0 = arith.constant 0 : index
    %0 = vector.load %arg2[%c0, %c0_0] : memref<16x160xbf16, #tpu.memory_space<vmem>>, vector<16x160xbf16>
    %c0_1 = arith.constant 0 : index
    %c0_2 = arith.constant 0 : index
    %c0_3 = arith.constant 0 : index
    %1 = vector.load %arg1[%c0_1, %c0_2, %c0_3] : memref<4x160x128xbf16, #tpu.memory_space<vmem>>, vector<1x160x128xbf16>
    %2 = vector.shape_cast %1 : vector<1x160x128xbf16> to vector<160x128xbf16>
    %cst = arith.constant dense<0.000000e+00> : vector<16x128xf32>
    %3 = tpu.matmul %0, %2, %cst {dimension_numbers = #tpu.dot_dimension_numbers<[1], [0], [0], [1], [0, 0, 1, 1], [], []>} : vector<16x160xbf16>, vector<160x128xbf16>, vector<16x128xf32> -> vector<16x128xf32>
    %c1 = arith.constant 1 : index
    %c0_4 = arith.constant 0 : index
    %c0_5 = arith.constant 0 : index
    %4 = vector.load %arg1[%c1, %c0_4, %c0_5] : memref<4x160x128xbf16, #tpu.memory_space<vmem>>, vector<1x160x128xbf16>
    %5 = vector.shape_cast %4 : vector<1x160x128xbf16> to vector<160x128xbf16>
    %cst_6 = arith.constant dense<0.000000e+00> : vector<16x128xf32>
    %6 = tpu.matmul %0, %5, %cst_6 {dimension_numbers = #tpu.dot_dimension_numbers<[1], [0], [0], [1], [0, 0, 1, 1], [], []>} : vector<16x160xbf16>, vector<160x128xbf16>, vector<16x128xf32> -> vector<16x128xf32>
    %7 = arith.maximumf %3, %6 : vector<16x128xf32>
    %c2 = arith.constant 2 : index
    %c0_7 = arith.constant 0 : index
    %c0_8 = arith.constant 0 : index
    %8 = vector.load %arg1[%c2, %c0_7, %c0_8] : memref<4x160x128xbf16, #tpu.memory_space<vmem>>, vector<1x160x128xbf16>
    %9 = vector.shape_cast %8 : vector<1x160x128xbf16> to vector<160x128xbf16>
    %cst_9 = arith.constant dense<0.000000e+00> : vector<16x128xf32>
    %10 = tpu.matmul %0, %9, %cst_9 {dimension_numbers = #tpu.dot_dimension_numbers<[1], [0], [0], [1], [0, 0, 1, 1], [], []>} : vector<16x160xbf16>, vector<160x128xbf16>, vector<16x128xf32> -> vector<16x128xf32>
    %11 = arith.maximumf %7, %10 : vector<16x128xf32>
    %c3 = arith.constant 3 : index
    %c0_10 = arith.constant 0 : index
    %c0_11 = arith.constant 0 : index
    %12 = vector.load %arg1[%c3, %c0_10, %c0_11] : memref<4x160x128xbf16, #tpu.memory_space<vmem>>, vector<1x160x128xbf16>
    %13 = vector.shape_cast %12 : vector<1x160x128xbf16> to vector<160x128xbf16>
    %cst_12 = arith.constant dense<0.000000e+00> : vector<16x128xf32>
    %14 = tpu.matmul %0, %13, %cst_12 {dimension_numbers = #tpu.dot_dimension_numbers<[1], [0], [0], [1], [0, 0, 1, 1], [], []>} : vector<16x160xbf16>, vector<160x128xbf16>, vector<16x128xf32> -> vector<16x128xf32>
    %15 = arith.maximumf %11, %14 : vector<16x128xf32>
    %c0_13 = arith.constant 0 : index
    %c0_14 = arith.constant 0 : index
    %16 = vector.load %arg3[%c0_13, %c0_14] : memref<16x1xf32, #tpu.memory_space<vmem>>, vector<16x1xf32>
    %17 = vector.broadcast %16 : vector<16x1xf32> to vector<16x128xf32>
    %18 = arith.addf %15, %17 : vector<16x128xf32>
    %cst_15 = arith.constant 0.000000e+00 : f32
    %19 = vector.broadcast %cst_15 : f32 to vector<16x128xf32>
    %20 = arith.subf %19, %18 : vector<16x128xf32>
    %21 = math.exp %20 : vector<16x128xf32>
    %cst_16 = arith.constant 1.000000e+00 : f32
    %22 = vector.broadcast %cst_16 : f32 to vector<16x128xf32>
    %23 = arith.addf %22, %21 : vector<16x128xf32>
    %24 = tpu.reciprocal %23 {approx = true} : vector<16x128xf32> -> vector<16x128xf32>
    %25 = arith.truncf %24 : vector<16x128xf32> to vector<16x128xbf16>
    %c0_17 = arith.constant 0 : index
    %c0_18 = arith.constant 0 : index
    %26 = vector.load %arg4[%c0_17, %c0_18] : memref<16x128xbf16, #tpu.memory_space<vmem>>, vector<16x128xbf16>
    tpu.vector_store %arg4[%c0_17, %c0_18], %25 {strides = array<i32>} : memref<16x128xbf16, #tpu.memory_space<vmem>>, vector<16x128xbf16>,
    return
  }
  func.func @transform_0(%arg0: i32) -> (i32, i32, i32) {
    %c0_i32 = arith.constant 0 : i32
    %c0_i32_0 = arith.constant 0 : i32
    %c0_i32_1 = arith.constant 0 : i32
    return %c0_i32, %c0_i32_0, %arg0 : i32, i32, i32
  }
  func.func @transform_1(%arg0: i32) -> (i32, i32) {
    %c0_i32 = arith.constant 0 : i32
    %c0_i32_0 = arith.constant 0 : i32
    %c0_i32_1 = arith.constant 0 : i32
    return %c0_i32, %c0_i32_0 : i32, i32
  }
  func.func @transform_2(%arg0: i32) -> (i32, i32) {
    %c0_i32 = arith.constant 0 : i32
    %c0_i32_0 = arith.constant 0 : i32
    %c0_i32_1 = arith.constant 0 : i32
    return %c0_i32, %c0_i32_0 : i32, i32
  }
  func.func @transform_3(%arg0: i32) -> (i32, i32) {
    %c0_i32 = arith.constant 0 : i32
    %c0_i32_0 = arith.constant 0 : i32
    return %c0_i32, %arg0 : i32, i32
  }
}

module attributes {stable_mosaic.version = 11 : i64} {
  func.func @_fc_fused_kernel(%arg0: i32, %arg1: memref<16x400xbf16, #tpu.memory_space<vmem>>, %arg2: memref<400x128xbf16, #tpu.memory_space<vmem>>, %arg3: memref<1x128xf32, #tpu.memory_space<vmem>>, %arg4: memref<128x128xbf16, #tpu.memory_space<vmem>>, %arg5: memref<1x128xf32, #tpu.memory_space<vmem>>, %arg6: memref<128x128xbf16, #tpu.memory_space<vmem>>, %arg7: memref<1x128xf32, #tpu.memory_space<vmem>>, %arg8: memref<16x128xf32, #tpu.memory_space<vmem>>) attributes {dimension_semantics = [#tpu.dimension_semantics<parallel>], iteration_bounds = array<i64: 1>, scalar_prefetch = 0 : i64, scratch_operands = 0 : i64, tpu.core_type = #tpu.core_type<tc>, window_params = [{transform_indices = @transform_0, window_bounds = array<i64: 16, 400>}, {pipeline_mode = #tpu.pipeline_mode<synchronous>, transform_indices = @transform_1, window_bounds = array<i64: 400, 128>}, {pipeline_mode = #tpu.pipeline_mode<synchronous>, transform_indices = @transform_2, window_bounds = array<i64: 1, 128>}, {pipeline_mode = #tpu.pipeline_mode<synchronous>, transform_indices = @transform_3, window_bounds = array<i64: 128, 128>}, {pipeline_mode = #tpu.pipeline_mode<synchronous>, transform_indices = @transform_4, window_bounds = array<i64: 1, 128>}, {pipeline_mode = #tpu.pipeline_mode<synchronous>, transform_indices = @transform_5, window_bounds = array<i64: 128, 128>}, {pipeline_mode = #tpu.pipeline_mode<synchronous>, transform_indices = @transform_6, window_bounds = array<i64: 1, 128>}, {transform_indices = @transform_7, window_bounds = array<i64: 16, 128>}]} {
    %c0 = arith.constant 0 : index
    %c0_0 = arith.constant 0 : index
    %0 = vector.load %arg1[%c0, %c0_0] : memref<16x400xbf16, #tpu.memory_space<vmem>>, vector<16x400xbf16>
    %c0_1 = arith.constant 0 : index
    %c0_2 = arith.constant 0 : index
    %1 = vector.load %arg2[%c0_1, %c0_2] : memref<400x128xbf16, #tpu.memory_space<vmem>>, vector<400x128xbf16>
    %cst = arith.constant dense<0.000000e+00> : vector<16x128xf32>
    %2 = tpu.matmul %0, %1, %cst {dimension_numbers = #tpu.dot_dimension_numbers<[1], [0], [0], [1], [0, 0, 1, 1], [], []>} : vector<16x400xbf16>, vector<400x128xbf16>, vector<16x128xf32> -> vector<16x128xf32>
    %c0_3 = arith.constant 0 : index
    %c0_4 = arith.constant 0 : index
    %3 = vector.load %arg3[%c0_3, %c0_4] : memref<1x128xf32, #tpu.memory_space<vmem>>, vector<1x128xf32>
    %4 = vector.broadcast %3 : vector<1x128xf32> to vector<16x128xf32>
    %5 = arith.addf %2, %4 : vector<16x128xf32>
    %6 = math.tanh %5 : vector<16x128xf32>
    %7 = arith.truncf %6 : vector<16x128xf32> to vector<16x128xbf16>
    %c0_5 = arith.constant 0 : index
    %c0_6 = arith.constant 0 : index
    %8 = vector.load %arg4[%c0_5, %c0_6] : memref<128x128xbf16, #tpu.memory_space<vmem>>, vector<128x128xbf16>
    %cst_7 = arith.constant dense<0.000000e+00> : vector<16x128xf32>
    %9 = tpu.matmul %7, %8, %cst_7 {dimension_numbers = #tpu.dot_dimension_numbers<[1], [0], [0], [1], [0, 0, 1, 1], [], []>} : vector<16x128xbf16>, vector<128x128xbf16>, vector<16x128xf32> -> vector<16x128xf32>
    %c0_8 = arith.constant 0 : index
    %c0_9 = arith.constant 0 : index
    %10 = vector.load %arg5[%c0_8, %c0_9] : memref<1x128xf32, #tpu.memory_space<vmem>>, vector<1x128xf32>
    %11 = vector.broadcast %10 : vector<1x128xf32> to vector<16x128xf32>
    %12 = arith.addf %9, %11 : vector<16x128xf32>
    %13 = math.tanh %12 : vector<16x128xf32>
    %14 = arith.truncf %13 : vector<16x128xf32> to vector<16x128xbf16>
    %c0_10 = arith.constant 0 : index
    %c0_11 = arith.constant 0 : index
    %15 = vector.load %arg6[%c0_10, %c0_11] : memref<128x128xbf16, #tpu.memory_space<vmem>>, vector<128x128xbf16>
    %cst_12 = arith.constant dense<0.000000e+00> : vector<16x128xf32>
    %16 = tpu.matmul %14, %15, %cst_12 {dimension_numbers = #tpu.dot_dimension_numbers<[1], [0], [0], [1], [0, 0, 1, 1], [], []>} : vector<16x128xbf16>, vector<128x128xbf16>, vector<16x128xf32> -> vector<16x128xf32>
    %c0_13 = arith.constant 0 : index
    %c0_14 = arith.constant 0 : index
    %17 = vector.load %arg7[%c0_13, %c0_14] : memref<1x128xf32, #tpu.memory_space<vmem>>, vector<1x128xf32>
    %18 = vector.broadcast %17 : vector<1x128xf32> to vector<16x128xf32>
    %19 = arith.addf %16, %18 : vector<16x128xf32>
    %c0_15 = arith.constant 0 : index
    %c0_16 = arith.constant 0 : index
    %20 = vector.load %arg8[%c0_15, %c0_16] : memref<16x128xf32, #tpu.memory_space<vmem>>, vector<16x128xf32>
    tpu.vector_store %arg8[%c0_15, %c0_16], %19 {strides = array<i32>} : memref<16x128xf32, #tpu.memory_space<vmem>>, vector<16x128xf32>,
    return
  }
  func.func @transform_0(%arg0: i32) -> (i32, i32) {
    %c0_i32 = arith.constant 0 : i32
    %c0_i32_0 = arith.constant 0 : i32
    return %arg0, %c0_i32 : i32, i32
  }
  func.func @transform_1(%arg0: i32) -> (i32, i32) {
    %c0_i32 = arith.constant 0 : i32
    %c0_i32_0 = arith.constant 0 : i32
    %c0_i32_1 = arith.constant 0 : i32
    return %c0_i32, %c0_i32_0 : i32, i32
  }
  func.func @transform_2(%arg0: i32) -> (i32, i32) {
    %c0_i32 = arith.constant 0 : i32
    %c0_i32_0 = arith.constant 0 : i32
    %c0_i32_1 = arith.constant 0 : i32
    return %c0_i32, %c0_i32_0 : i32, i32
  }
  func.func @transform_3(%arg0: i32) -> (i32, i32) {
    %c0_i32 = arith.constant 0 : i32
    %c0_i32_0 = arith.constant 0 : i32
    %c0_i32_1 = arith.constant 0 : i32
    return %c0_i32, %c0_i32_0 : i32, i32
  }
  func.func @transform_4(%arg0: i32) -> (i32, i32) {
    %c0_i32 = arith.constant 0 : i32
    %c0_i32_0 = arith.constant 0 : i32
    %c0_i32_1 = arith.constant 0 : i32
    return %c0_i32, %c0_i32_0 : i32, i32
  }
  func.func @transform_5(%arg0: i32) -> (i32, i32) {
    %c0_i32 = arith.constant 0 : i32
    %c0_i32_0 = arith.constant 0 : i32
    %c0_i32_1 = arith.constant 0 : i32
    return %c0_i32, %c0_i32_0 : i32, i32
  }
  func.func @transform_6(%arg0: i32) -> (i32, i32) {
    %c0_i32 = arith.constant 0 : i32
    %c0_i32_0 = arith.constant 0 : i32
    %c0_i32_1 = arith.constant 0 : i32
    return %c0_i32, %c0_i32_0 : i32, i32
  }
  func.func @transform_7(%arg0: i32) -> (i32, i32) {
    %c0_i32 = arith.constant 0 : i32
    %c0_i32_0 = arith.constant 0 : i32
    return %arg0, %c0_i32 : i32, i32
  }
}

</mosaic_0001>

<bundles_post_ra>
// kernel: lenet5_forward.3
= control target key start
LH: loop header
LB: loop body
LE: loop exit
PB: predicated region body
PF: predicated region fallthrough
CT: control target
= control target key end

     0   :  { %s783_s12 = smov 0   ;;  %s785_s13 = smov 0   ;;  %s881_s0 = inlined_call_operand.vmem [shape: bf16[4,32,512], index: 0, kind: input, shape index: {}]   ;;  %s882_s1 = inlined_call_operand.vmem [shape: bf16[6,32], index: 1, kind: input, shape index: {}]   ;;  %s883_s2 = inlined_call_operand.vmem [shape: f32[6,1], index: 2, kind: input, shape index: {}]   ;;  %s884_s3 = inlined_call_operand.vmem [shape: bf16[6,512], index: 3, kind: output, shape index: {}]  }
   0x1   :  { %s787_s14 = smov 0  }
   0x2 LB: > { %s632_s15 = sadd.s32 4294967295, %s760_s14   ;;  %s800_s16 = sadd.s32 1, %s760_s14   ;;  %s760_s14 = sphi %s787_s14, %s887_s14   ;;  %s756_s13 = sphi %s785_s13, %s886_s13   ;;  %s752_s12 = sphi %s783_s12, %s885_s12  }
   0x3   : > { %s17_s17 = ssub.s32 %s760_s14, %s800_s16  ;;  %s20_s18 = sadd.s32 1, %s756_s13 }
   0x4   : > { %p18_p0 = scmp.eq.s32.totalorder %s17_s17, 0  ;;  %p27_p1 = scmp.ne.s32.totalorder %s756_s13, %s752_s12 }
   0x5   : > { %p28_p2 = scmp.eq.s32.totalorder %s760_s14, 0  ;;  %p635_p4 = scmp.ge.s32.totalorder %s760_s14, 2 }
   0x6   : > { %s809_s19 = scalar_select %p18_p0, %s756_s13, %s20_s18  }
   0x7   : > { %p29_p3 = por %p28_p2, %p27_p1  ;;  %127 = sbr.rel (%p635_p4) target bundleno = 26 (0x1a), region = 24 }
   0xe   : > { %130 = sbr.rel (!%p29_p3) target bundleno = 26 (0x1a), region = 28  ;;  %s132_s20 = sand.u32 (%p29_p3), 1, %s756_s13  }
   0xf   : > { %s678_s21 = sshll.u32 (%p29_p3), %s760_s14, 3  ;;  %s636_s22 = sshll.u32 (%p29_p3), %s132_s20, 7 }
  0x10   : > { %s817_s25 = scalar_lea.vmem (%p29_p3), %s881_s0, %s678_s21  ;;  %s134_s26 = scalar_lea.vmem (%p29_p3), [#allocation2], %s636_s22 }
  0x11   : > { %v195_v0 = vld [vmem:[%s817_s25] sm:$0xff] (%p29_p3)  ;;  %v197_v1 = vld [vmem:[%s817_s25 + $0x10] sm:$0xff] (%p29_p3) }
  0x12   : > { %v199_v2 = vld [vmem:[%s817_s25 + $0x20] sm:$0xff] (%p29_p3)  ;;  %196 = vst [vmem:[%s134_s26] sm:$0xff] (%p29_p3), %v195_v0  ;;  %198 = vst [vmem:[%s134_s26 + $0x8] sm:$0xff] (%p29_p3), %v197_v1  ;;  %v201_v3 = vld [vmem:[%s817_s25 + $0x30] sm:$0xff] (%p29_p3) }
  0x13   : > { %200 = vst [vmem:[%s134_s26 + $0x10] sm:$0xff] (%p29_p3), %v199_v2  ;;  %v203_v4 = vld [vmem:[%s817_s25 + $0x40] sm:$0xff] (%p29_p3)  ;;  %v205_v5 = vld [vmem:[%s817_s25 + $0x50] sm:$0xff] (%p29_p3)  ;;  %202 = vst [vmem:[%s134_s26 + $0x18] sm:$0xff] (%p29_p3), %v201_v3 }
  0x14   : > { %204 = vst [vmem:[%s134_s26 + $0x20] sm:$0xff] (%p29_p3), %v203_v4  ;;  %206 = vst [vmem:[%s134_s26 + $0x28] sm:$0xff] (%p29_p3), %v205_v5  ;;  %v207_v6 = vld [vmem:[%s817_s25 + $0x60] sm:$0xff] (%p29_p3)  ;;  %v209_v7 = vld [vmem:[%s817_s25 + $0x70] sm:$0xff] (%p29_p3) }
  0x15   : > { %v211_v8 = vld [vmem:[%s817_s25 + $0x80] sm:$0xff]  ;;  %208 = vst [vmem:[%s134_s26 + $0x30] sm:$0xff] %v207_v6  ;;  %210 = vst [vmem:[%s134_s26 + $0x38] sm:$0xff] %v209_v7  ;;  %v213_v9 = vld [vmem:[%s817_s25 + $0x90] sm:$0xff] }
  0x16   : > { %212 = vst [vmem:[%s134_s26 + $0x40] sm:$0xff] %v211_v8  ;;  %v215_v10 = vld [vmem:[%s817_s25 + $0xa0] sm:$0xff]  ;;  %v217_v11 = vld [vmem:[%s817_s25 + $0xb0] sm:$0xff]  ;;  %214 = vst [vmem:[%s134_s26 + $0x48] sm:$0xff] %v213_v9 }
  0x17   : > { %216 = vst [vmem:[%s134_s26 + $0x50] sm:$0xff] %v215_v10  ;;  %218 = vst [vmem:[%s134_s26 + $0x58] sm:$0xff] %v217_v11  ;;  %v219_v12 = vld [vmem:[%s817_s25 + $0xc0] sm:$0xff]  ;;  %v221_v13 = vld [vmem:[%s817_s25 + $0xd0] sm:$0xff] }
  0x18   : > { %v223_v14 = vld [vmem:[%s817_s25 + $0xe0] sm:$0xff]  ;;  %220 = vst [vmem:[%s134_s26 + $0x60] sm:$0xff] %v219_v12  ;;  %222 = vst [vmem:[%s134_s26 + $0x68] sm:$0xff] %v221_v13  ;;  %v225_v15 = vld [vmem:[%s817_s25 + $0xf0] sm:$0xff] }
  0x19   : > { %224 = vst [vmem:[%s134_s26 + $0x70] sm:$0xff] %v223_v14  ;;  %226 = vst [vmem:[%s134_s26 + $0x78] sm:$0xff] %v225_v15 }
  0x1a PF: > { %p639_p5 = scmp.ge.s32.totalorder %s760_s14, 1  ;;  %p231_p6 = scmp.lt.s32.totalorder %s760_s14, 3 }
  0x1c   : > { %p232_p7 = pnand %p639_p5, %p231_p6 }
  0x1d   : > { %s238_s27 = sand.u32 (!%p232_p7), 1, %s752_s12   ;;  %v762_v16 = vmov (!%p232_p7), 0   ;;  %v543_v17 = vld [vmem:[%s883_s2] sm:$0x3f] (!%p232_p7)  ;;  %vm294_vm0 = vcmask (!%p232_p7), 261120   ;;  %s641_s7 = sshll.u32 (!%p232_p7), %s632_s15, 1 }
  0x1e   : > { %235 = sbr.rel (%p232_p7) target bundleno = 299 (0x12b), region = 66  ;;  %s640_s28 = sshll.u32 (!%p232_p7), %s238_s27, 7  ;;  %330 = vmatprep.mubr.bf16.mxu0 (!%p232_p7), %v762_v16  ;;  %396 = vmatprep.mubr.bf16.mxu1 (!%p232_p7), %v762_v16  ;;  %v269_v26 = vld [vmem:[%s882_s1] sm:$0x7] (!%p232_p7) }
  0x1f   : > { %705 = vset.pattern.permute.xlu0 (!%p232_p7), %v762_v16  ;;  %s841_s4 = scalar_lea.vmem (!%p232_p7), [#allocation2], %s640_s28  ;;  %p263_p8 = scmp.lt.s32.totalorder (!%p232_p7), %s641_s7, 3 }
  0x20   : > { %v706_v18 = vld [vmem:[%s841_s4 + $0x4] ss:$8 sps:$4 sm:$0xff] (!%p232_p7)   ;;  %546 = vperm.xlu0 (!%p232_p7), %705, %v543_v17   ;;  %v710_v20 = vld [vmem:[%s841_s4] ss:$8 sps:$4 sm:$0xff] (!%p232_p7)   ;;  %v712_v22 = vld [vmem:[%s841_s4 + $0x14] ss:$8 sps:$4 sm:$0xff] (!%p232_p7)  }
  0x21   : > { %v708_v19 = vld [vmem:[%s841_s4 + $0x24] ss:$8 sps:$4 sm:$0xff] (!%p232_p7)   ;;  %298 = vmatprep.subr.bf16.mxu0 (!%p232_p7), %v706_v18  ;;  %v711_v21 = vld [vmem:[%s841_s4 + $0x20] ss:$8 sps:$4 sm:$0xff] (!%p232_p7)   ;;  %v714_v23 = vld [vmem:[%s841_s4 + $0x34] ss:$8 sps:$4 sm:$0xff] (!%p232_p7)  }
  0x22   : > { %364 = vmatprep.subr.bf16.mxu1 (!%p232_p7), %v708_v19  ;;  %299 = vmatpush1.bf16.msra.mxu0 (!%p232_p7), %v710_v20  ;;  %v716_v24 = vld [vmem:[%s841_s4 + $0x10] ss:$8 sps:$4 sm:$0xff] (!%p232_p7)   ;;  %v720_v27 = vld [vmem:[%s841_s4 + $0x44] ss:$8 sps:$4 sm:$0xff] (!%p232_p7)   ;;  %v718_v28 = vld [vmem:[%s841_s4 + $0x40] ss:$8 sps:$4 sm:$0xff] (!%p232_p7)  }
  0x23   : > { %365 = vmatpush1.bf16.msra.mxu1 (!%p232_p7), %v711_v21  ;;  %300 = vmatprep.subr.bf16.mxu0 (!%p232_p7), %v712_v22  ;;  %v717_v25 = vld [vmem:[%s841_s4 + $0x30] ss:$8 sps:$4 sm:$0xff] (!%p232_p7)   ;;  %v723_v29 = vld [vmem:[%s841_s4 + $0x64] ss:$8 sps:$4 sm:$0xff] (!%p232_p7)   ;;  %v721_v30 = vld [vmem:[%s841_s4 + $0x60] ss:$8 sps:$4 sm:$0xff] (!%p232_p7)  }
  0x24   : > { %366 = vmatprep.subr.bf16.mxu1 (!%p232_p7), %v714_v23  ;;  %v726_v31 = vld [vmem:[%s841_s4 + $0x54] ss:$8 sps:$4 sm:$0xff] (!%p232_p7)   ;;  %v724_v33 = vld [vmem:[%s841_s4 + $0x50] ss:$8 sps:$4 sm:$0xff] (!%p232_p7)  }
  0x25   : > { %v729_v32 = vld [vmem:[%s841_s4 + $0x74] ss:$8 sps:$4 sm:$0xff]   ;;  %v727_v34 = vld [vmem:[%s841_s4 + $0x70] ss:$8 sps:$4 sm:$0xff]   ;;  %s889_s7 = smov (!%p263_p8, %s641_s7), 3 }
  0x26   : > { %301 = vmatpush1.bf16.msra.mxu0 %v716_v24  ;;  %s642_s8 = sshll.u32 %s889_s7, 2 }
  0x27   : > { %367 = vmatpush1.bf16.msra.mxu1 %v717_v25  ;;  %432 = vmatprep.subr.bf16.mxu0 %v720_v27  ;;  %s266_s11 = scalar_lea.vmem %s884_s3, %s642_s8 }
  0x28   : > { %500 = vmatprep.subr.bf16.mxu1 %v723_v29 }
  0x29   : > { %647 = vmatmul.mubr.msk.bf16.vlgmr.msra.gmra.mrb[0].mxu0 %vm294_vm0, %v269_v26 }
  0x2a   : > { %656 = vmatmul.mubr.msk.bf16.vlgmr.msra.gmra.mrb[0].mxu1 %vm294_vm0, %v269_v26  ;;  %433 = vmatpush1.bf16.msra.mxu0 %v718_v28 }
  0x2b   : > { %501 = vmatpush1.bf16.msra.mxu1 %v721_v30  ;;  %434 = vmatprep.subr.bf16.mxu0 %v726_v31 }
  0x2c   : > { %502 = vmatprep.subr.bf16.mxu1 %v729_v32  ;;  %464 = vmatprep.mubr.bf16.mxu0 %v762_v16 }
  0x2d   : > { %532 = vmatprep.mubr.bf16.mxu1 %v762_v16 }
  0x2e   : > { %435 = vmatpush1.bf16.msra.mxu0 %v724_v33 }
  0x2f   : > { %503 = vmatpush1.bf16.msra.mxu1 %v727_v34 }
  0x31   : > { %665 = vmatmul.mubr.msk.bf16.vlgmr.msra.gmra.mrb[4].mxu0 %vm294_vm0, %v269_v26 }
  0x32   : > { %674 = vmatmul.mubr.msk.bf16.vlgmr.msra.gmra.mrb[4].mxu1 %vm294_vm0, %v269_v26 }
  0x9f   : > { %v547_v45 = vpop.permute.xlu0 %546 }
  0xfc   : > { %v332_v35 = vpop.f32.mrb[0].mxu0 }
  0xfd   : > { %v398_v36 = vpop.f32.mrb[0].mxu1  ;;  %v334_v38 = vpop.f32.mrb[1].mxu0 }
  0xfe   : > { %v405_v37 = vmax.f32 %v332_v35, %v398_v36  ;;  %v400_v39 = vpop.f32.mrb[1].mxu1  ;;  %v336_v41 = vpop.f32.mrb[2].mxu0 }
  0xff   : > { %v406_v40 = vmax.f32 %v334_v38, %v400_v39  ;;  %v402_v42 = vpop.f32.mrb[2].mxu1  ;;  %v337_v43 = vpop.f32.mrb[3].mxu0 }
 0x100   : > { %v403_v44 = vpop.f32.mrb[3].mxu1 }
 0x104   : > { %v466_v46 = vpop.f32.mrb[4].mxu0 }
 0x105   : > { %v534_v47 = vpop.f32.mrb[4].mxu1  ;;  %v473_v48 = vmax.f32 %v405_v37, %v466_v46  ;;  %v468_v49 = vpop.f32.mrb[5].mxu0 }
 0x106   : > { %v536_v50 = vpop.f32.mrb[5].mxu1  ;;  %v474_v51 = vmax.f32 %v406_v40, %v468_v49  ;;  %v470_v52 = vpop.f32.mrb[6].mxu0 }
 0x107   : > { %v538_v53 = vpop.f32.mrb[6].mxu1  ;;  %v541_v54 = vmax.f32 %v473_v48, %v534_v47  ;;  %v471_v55 = vpop.f32.mrb[7].mxu0 }
 0x108   : > { %v539_v56 = vpop.f32.mrb[7].mxu1  ;;  %v542_v57 = vmax.f32 %v474_v51, %v536_v50 }
 0x109   : > { %v549_v58 = vadd.f32 %v547_v45, %v541_v54 }
 0x10a   : > { %v550_v59 = vadd.f32 %v547_v45, %v542_v57 }
 0x10b   : > { %v551_v60 = vsub.f32 0.0, %v549_v58 }
 0x10c   : > { %v552_v61 = vsub.f32 0.0, %v550_v59 }
 0x10d   : > { %v553_v62 = vmul.f32 1.442695, %v551_v60 }
 0x10e   : > { %v555_v63 = vmul.f32 1.442695, %v552_v61 }
 0x10f   : > { %730 = vpow2.f32 %v553_v62 }
 0x110   : > { %732 = vpow2.f32 %v555_v63 }
 0x119   : > { %v731_v0 = vpop.eup %730 }
 0x11a   : > { %v733_v1 = vpop.eup %732  ;;  %v557_v2 = vadd.f32 1.0, %v731_v0 }
 0x11b   : > { %v558_v3 = vadd.f32 1.0, %v733_v1 }
 0x11c   : > { %734 = vrcp.f32 %v557_v2 }
 0x11d   : > { %736 = vrcp.f32 %v558_v3 }
 0x126   : > { %v735_v4 = vpop.eup %734 }
 0x127   : > { %v737_v5 = vpop.eup %736 }
 0x128   : > { %v679_v6 = vpack.c.bf16 %v737_v5, %v735_v4 }
 0x12a   : > { %569 = vst [vmem:[%s266_s11] sm:$0x77] %v679_v6 }
 0x12b PF: > { %p10_p9 = scmp.ge.s32.totalorder %s800_s16, 4   ;;  %s885_s12 = smov %s756_s13 }
 0x12c   : > { %s886_s13 = smov %s809_s19  ;;  %s887_s14 = smov %s800_s16 }
 0x12d   :  { %12 = sbr.rel (!%p10_p9) target bundleno = 2 (0x2), region = 108 }

// kernel: lenet5_forward.4
= control target key start
LH: loop header
LB: loop body
LE: loop exit
PB: predicated region body
PF: predicated region fallthrough
CT: control target
= control target key end

     0   :  { %v729_v0 = vmov 0   ;;  %vm106_vm0 = vcmask 261120   ;;  %s936_s0 = inlined_call_operand.vmem [shape: bf16[4,160,128], index: 0, kind: input, shape index: {}]   ;;  %s937_s1 = inlined_call_operand.vmem [shape: bf16[16,160], index: 1, kind: input, shape index: {}]   ;;  %s938_s2 = inlined_call_operand.vmem [shape: f32[16,1], index: 2, kind: input, shape index: {}]   ;;  %s939_s3 = inlined_call_operand.vmem [shape: bf16[16,128], index: 3, kind: output, shape index: {}]  }
   0x1   :  { %110 = vmatprep.subr.bf16.mxu0 %v729_v0  ;;  %232 = vmatprep.subr.bf16.mxu1 %v729_v0  ;;  %v678_v1 = vld [vmem:[%s936_s0] sm:$0xff]   ;;  %v679_v2 = vld [vmem:[%s936_s0 + $0x50] sm:$0xff]   ;;  %v680_v3 = vld [vmem:[%s936_s0 + $0x8] sm:$0xff]  }
   0x2   :  { %677 = vset.pattern.permute.xlu0 %v729_v0  ;;  %111 = vmatpush1.bf16.msra.mxu0 %v678_v1  ;;  %v681_v4 = vld [vmem:[%s936_s0 + $0x58] sm:$0xff]   ;;  %v682_v5 = vld [vmem:[%s936_s0 + $0x10] sm:$0xff]   ;;  %v683_v6 = vld [vmem:[%s936_s0 + $0x60] sm:$0xff]  }
   0x3   :  { %233 = vmatpush1.bf16.msra.mxu1 %v679_v2  ;;  %112 = vmatprep.subr.bf16.mxu0 %v729_v0  ;;  %v684_v7 = vld [vmem:[%s936_s0 + $0x18] sm:$0xff]   ;;  %v685_v8 = vld [vmem:[%s936_s0 + $0x68] sm:$0xff]   ;;  %v686_v9 = vld [vmem:[%s936_s0 + $0x20] sm:$0xff]  }
   0x4   :  { %234 = vmatprep.subr.bf16.mxu1 %v729_v0  ;;  %v687_v10 = vld [vmem:[%s936_s0 + $0x70] sm:$0xff]   ;;  %v688_v11 = vld [vmem:[%s936_s0 + $0x28] sm:$0xff]   ;;  %v689_v12 = vld [vmem:[%s936_s0 + $0x78] sm:$0xff]  }
   0x5   :  { %v698_v13 = vld [vmem:[%s937_s1 + $0x4] ss:$8 sps:$4 sm:$0xff]   ;;  %v690_v14 = vld [vmem:[%s936_s0 + $0x30] sm:$0xff]   ;;  %v692_v16 = vld [vmem:[%s936_s0 + $0x38] sm:$0xff]  }
   0x6   :  { %113 = vmatpush1.bf16.msra.mxu0 %v680_v3  ;;  %573 = vmatprep.mubr.msk.bf16.mxu0 %vm106_vm0, %v698_v13  ;;  %v691_v15 = vld [vmem:[%s936_s0 + $0x80] sm:$0xff]   ;;  %v693_v17 = vld [vmem:[%s936_s0 + $0x88] sm:$0xff]   ;;  %v695_v19 = vld [vmem:[%s936_s0 + $0x90] sm:$0xff]  }
   0x7   :  { %235 = vmatpush1.bf16.msra.mxu1 %v681_v4  ;;  %114 = vmatprep.subr.bf16.mxu0 %v729_v0  ;;  %v694_v18 = vld [vmem:[%s936_s0 + $0x40] sm:$0xff]   ;;  %v696_v20 = vld [vmem:[%s936_s0 + $0x48] sm:$0xff]   ;;  %v697_v21 = vld [vmem:[%s936_s0 + $0x98] sm:$0xff]  }
   0x8   :  { %236 = vmatprep.subr.bf16.mxu1 %v729_v0  ;;  %604 = vmatprep.mubr.msk.bf16.mxu1 %vm106_vm0, %v698_v13  ;;  %v839_v22 = vld [vmem:[%s937_s1] ss:$8 sps:$4 sm:$0xff]   ;;  %v702_v24 = vld [vmem:[%s936_s0 + $0xf0] sm:$0xff]   ;;  %v704_v27 = vld [vmem:[%s936_s0 + $0xf8] sm:$0xff]  }
   0x9   :  { %v701_v23 = vld [vmem:[%s936_s0 + $0xa0] sm:$0xff]   ;;  %v703_v25 = vld [vmem:[%s936_s0 + $0xa8] sm:$0xff]   ;;  %v705_v28 = vld [vmem:[%s936_s0 + $0xb0] sm:$0xff]  }
   0xa   :  { %115 = vmatpush1.bf16.msra.mxu0 %v682_v5  ;;  %v523_v26 = vld [vmem:[%s938_s2] sm:$0xff]  ;;  %v524_v29 = vld [vmem:[%s938_s2 + $0x8] sm:$0xff]  ;;  %v707_v31 = vld [vmem:[%s936_s0 + $0xb8] sm:$0xff]  }
   0xb   :  { %237 = vmatpush1.bf16.msra.mxu1 %v683_v6  ;;  %116 = vmatprep.subr.bf16.mxu0 %v729_v0  ;;  %v706_v30 = vld [vmem:[%s936_s0 + $0x100] sm:$0xff]   ;;  %v708_v32 = vld [vmem:[%s936_s0 + $0x108] sm:$0xff]   ;;  %v710_v34 = vld [vmem:[%s936_s0 + $0x110] sm:$0xff]  }
   0xc   :  { %238 = vmatprep.subr.bf16.mxu1 %v729_v0  ;;  %527 = vperm.xlu0 %677, %v523_v26   ;;  %v709_v33 = vld [vmem:[%s936_s0 + $0xc0] sm:$0xff]   ;;  %v711_v35 = vld [vmem:[%s936_s0 + $0xc8] sm:$0xff]   ;;  %v712_v36 = vld [vmem:[%s936_s0 + $0x118] sm:$0xff]  }
   0xd   :  { %v713_v37 = vld [vmem:[%s936_s0 + $0xd0] sm:$0xff]   ;;  %v714_v38 = vld [vmem:[%s936_s0 + $0x120] sm:$0xff]   ;;  %v715_v39 = vld [vmem:[%s936_s0 + $0xd8] sm:$0xff]  }
   0xe   :  { %117 = vmatpush1.bf16.msra.mxu0 %v684_v7  ;;  %v716_v40 = vld [vmem:[%s936_s0 + $0x128] sm:$0xff]   ;;  %v717_v41 = vld [vmem:[%s936_s0 + $0xe0] sm:$0xff]   ;;  %v718_v42 = vld [vmem:[%s936_s0 + $0x130] sm:$0xff]  }
   0xf   :  { %239 = vmatpush1.bf16.msra.mxu1 %v685_v8  ;;  %118 = vmatprep.subr.bf16.mxu0 %v729_v0  ;;  %v719_v43 = vld [vmem:[%s936_s0 + $0xe8] sm:$0xff]   ;;  %v720_v44 = vld [vmem:[%s936_s0 + $0x138] sm:$0xff]  }
  0x10   :  { %240 = vmatprep.subr.bf16.mxu1 %v729_v0  ;;  %532 = vperm.xlu0 %677, %v524_v29  }
  0x12   :  { %119 = vmatpush1.bf16.msra.mxu0 %v686_v9 }
  0x13   :  { %241 = vmatpush1.bf16.msra.mxu1 %v687_v10  ;;  %120 = vmatprep.subr.bf16.mxu0 %v729_v0 }
  0x14   :  { %242 = vmatprep.subr.bf16.mxu1 %v729_v0 }
  0x16   :  { %121 = vmatpush1.bf16.msra.mxu0 %v688_v11 }
  0x17   :  { %243 = vmatpush1.bf16.msra.mxu1 %v689_v12  ;;  %122 = vmatprep.subr.bf16.mxu0 %v729_v0 }
  0x18   :  { %244 = vmatprep.subr.bf16.mxu1 %v729_v0 }
  0x1a   :  { %123 = vmatpush1.bf16.msra.mxu0 %v690_v14 }
  0x1b   :  { %245 = vmatpush1.bf16.msra.mxu1 %v691_v15  ;;  %124 = vmatprep.subr.bf16.mxu0 %v729_v0 }
  0x1c   :  { %246 = vmatprep.subr.bf16.mxu1 %v729_v0 }
  0x1e   :  { %125 = vmatpush1.bf16.msra.mxu0 %v692_v16 }
  0x1f   :  { %247 = vmatpush1.bf16.msra.mxu1 %v693_v17  ;;  %126 = vmatprep.subr.bf16.mxu0 %v729_v0 }
  0x20   :  { %248 = vmatprep.subr.bf16.mxu1 %v729_v0 }
  0x22   :  { %127 = vmatpush1.bf16.msra.mxu0 %v694_v18 }
  0x23   :  { %249 = vmatpush1.bf16.msra.mxu1 %v695_v19  ;;  %128 = vmatprep.subr.bf16.mxu0 %v729_v0 }
  0x24   :  { %250 = vmatprep.subr.bf16.mxu1 %v729_v0 }
  0x26   :  { %129 = vmatpush1.bf16.msra.mxu0 %v696_v20 }
  0x27   :  { %251 = vmatpush1.bf16.msra.mxu1 %v697_v21  ;;  %356 = vmatprep.subr.bf16.mxu0 %v729_v0 }
  0x28   :  { %480 = vmatprep.subr.bf16.mxu1 %v729_v0 }
  0x29   :  { %143 = vmatmul.mubr.bf16.vlgmr.msra.gmra.mrb[0].mxu0 %v839_v22 }
  0x2a   :  { %265 = vmatmul.mubr.bf16.vlgmr.msra.gmra.mrb[0].mxu1 %v839_v22  ;;  %357 = vmatpush1.bf16.msra.mxu0 %v701_v23 }
  0x2b   :  { %481 = vmatpush1.bf16.msra.mxu1 %v702_v24  ;;  %358 = vmatprep.subr.bf16.mxu0 %v729_v0 }
  0x2c   :  { %482 = vmatprep.subr.bf16.mxu1 %v729_v0  ;;  %635 = vmatprep.mubr.msk.bf16.mxu0 %vm106_vm0, %v698_v13 }
  0x2d   :  { %666 = vmatprep.mubr.msk.bf16.mxu1 %vm106_vm0, %v698_v13 }
  0x2e   :  { %359 = vmatpush1.bf16.msra.mxu0 %v703_v25 }
  0x2f   :  { %483 = vmatpush1.bf16.msra.mxu1 %v704_v27  ;;  %360 = vmatprep.subr.bf16.mxu0 %v729_v0 }
  0x30   :  { %484 = vmatprep.subr.bf16.mxu1 %v729_v0 }
  0x32   :  { %361 = vmatpush1.bf16.msra.mxu0 %v705_v28 }
  0x33   :  { %485 = vmatpush1.bf16.msra.mxu1 %v706_v30  ;;  %362 = vmatprep.subr.bf16.mxu0 %v729_v0 }
  0x34   :  { %486 = vmatprep.subr.bf16.mxu1 %v729_v0 }
  0x36   :  { %363 = vmatpush1.bf16.msra.mxu0 %v707_v31 }
  0x37   :  { %487 = vmatpush1.bf16.msra.mxu1 %v708_v32  ;;  %364 = vmatprep.subr.bf16.mxu0 %v729_v0 }
  0x38   :  { %488 = vmatprep.subr.bf16.mxu1 %v729_v0 }
  0x3a   :  { %365 = vmatpush1.bf16.msra.mxu0 %v709_v33 }
  0x3b   :  { %489 = vmatpush1.bf16.msra.mxu1 %v710_v34  ;;  %366 = vmatprep.subr.bf16.mxu0 %v729_v0 }
  0x3c   :  { %490 = vmatprep.subr.bf16.mxu1 %v729_v0 }
  0x3e   :  { %367 = vmatpush1.bf16.msra.mxu0 %v711_v35 }
  0x3f   :  { %491 = vmatpush1.bf16.msra.mxu1 %v712_v36  ;;  %368 = vmatprep.subr.bf16.mxu0 %v729_v0 }
  0x40   :  { %492 = vmatprep.subr.bf16.mxu1 %v729_v0 }
  0x42   :  { %369 = vmatpush1.bf16.msra.mxu0 %v713_v37 }
  0x43   :  { %493 = vmatpush1.bf16.msra.mxu1 %v714_v38  ;;  %370 = vmatprep.subr.bf16.mxu0 %v729_v0 }
  0x44   :  { %494 = vmatprep.subr.bf16.mxu1 %v729_v0 }
  0x46   :  { %371 = vmatpush1.bf16.msra.mxu0 %v715_v39 }
  0x47   :  { %495 = vmatpush1.bf16.msra.mxu1 %v716_v40  ;;  %372 = vmatprep.subr.bf16.mxu0 %v729_v0 }
  0x48   :  { %496 = vmatprep.subr.bf16.mxu1 %v729_v0 }
  0x4a   :  { %373 = vmatpush1.bf16.msra.mxu0 %v717_v41 }
  0x4b   :  { %497 = vmatpush1.bf16.msra.mxu1 %v718_v42  ;;  %374 = vmatprep.subr.bf16.mxu0 %v729_v0 }
  0x4c   :  { %498 = vmatprep.subr.bf16.mxu1 %v729_v0 }
  0x4e   :  { %375 = vmatpush1.bf16.msra.mxu0 %v719_v43 }
  0x4f   :  { %499 = vmatpush1.bf16.msra.mxu1 %v720_v44 }
  0x51   :  { %389 = vmatmul.mubr.bf16.vlgmr.msra.gmra.mrb[4].mxu0 %v839_v22 }
  0x52   :  { %513 = vmatmul.mubr.bf16.vlgmr.msra.gmra.mrb[4].mxu1 %v839_v22 }
  0x8b   :  { %v528_v55 = vpop.permute.xlu0 %527 }
  0x8f   :  { %v533_v5 = vpop.permute.xlu0 %532 }
  0xfc   :  { %v144_v45 = vpop.f32.mrb[0].mxu0 }
  0xfd   :  { %v266_v46 = vpop.f32.mrb[0].mxu1  ;;  %v146_v47 = vpop.f32.mrb[1].mxu0 }
  0xfe   :  { %v273_v48 = vmax.f32 %v144_v45, %v266_v46  ;;  %v268_v49 = vpop.f32.mrb[1].mxu1  ;;  %v147_v50 = vpop.f32.mrb[2].mxu0 }
  0xff   :  { %v269_v51 = vpop.f32.mrb[2].mxu1  ;;  %v149_v52 = vpop.f32.mrb[3].mxu0 }
 0x100   :  { %v274_v53 = vmax.f32 %v147_v50, %v269_v51  ;;  %v271_v54 = vpop.f32.mrb[3].mxu1 }
 0x124   :  { %v390_v56 = vpop.f32.mrb[4].mxu0 }
 0x125   :  { %v397_v57 = vmax.f32 %v273_v48, %v390_v56  ;;  %v514_v58 = vpop.f32.mrb[4].mxu1  ;;  %v392_v59 = vpop.f32.mrb[5].mxu0 }
 0x126   :  { %v516_v60 = vpop.f32.mrb[5].mxu1  ;;  %v393_v61 = vpop.f32.mrb[6].mxu0 }
 0x127   :  { %v521_v62 = vmax.f32 %v397_v57, %v514_v58  ;;  %v398_v63 = vmax.f32 %v274_v53, %v393_v61  ;;  %v517_v0 = vpop.f32.mrb[6].mxu1  ;;  %v395_v1 = vpop.f32.mrb[7].mxu0 }
 0x128   :  { %v519_v2 = vpop.f32.mrb[7].mxu1 }
 0x129   :  { %v535_v3 = vadd.f32 %v528_v55, %v521_v62  ;;  %v522_v4 = vmax.f32 %v398_v63, %v517_v0 }
 0x12b   :  { %v537_v6 = vsub.f32 0.0, %v535_v3  ;;  %v536_v7 = vadd.f32 %v533_v5, %v522_v4 }
 0x12d   :  { %v539_v8 = vmul.f32 1.442695, %v537_v6  ;;  %v538_v9 = vsub.f32 0.0, %v536_v7 }
 0x12f   :  { %721 = vpow2.f32 %v539_v8  ;;  %v541_v10 = vmul.f32 1.442695, %v538_v9 }
 0x131   :  { %723 = vpow2.f32 %v541_v10 }
 0x139   :  { %v722_v11 = vpop.eup %721 }
 0x13a   :  { %v543_v12 = vadd.f32 1.0, %v722_v11 }
 0x13b   :  { %v724_v13 = vpop.eup %723 }
 0x13c   :  { %v544_v14 = vadd.f32 1.0, %v724_v13  ;;  %725 = vrcp.f32 %v543_v12 }
 0x13e   :  { %727 = vrcp.f32 %v544_v14 }
 0x146   :  { %v726_v15 = vpop.eup %725 }
 0x148   :  { %v728_v16 = vpop.eup %727 }
 0x149   :  { %v674_v17 = vpack.c.bf16 %v728_v16, %v726_v15 }
 0x14b   :  { %675 = vst [vmem:[%s939_s3] sm:$0xff] %v674_v17  }

// kernel: lenet5_forward.5
= control target key start
LH: loop header
LB: loop body
LE: loop exit
PB: predicated region body
PF: predicated region fallthrough
CT: control target
= control target key end

     0   :  { %v766_v0 = vmov 0   ;;  %vm257_vm0 = vcmask 130048   ;;  %v767_v30 = vmov 0.0   ;;  %vm768_vm1 = vmmov 0   ;;  %s986_s1 = inlined_call_operand.vmem [shape: bf16[400,128], index: 1, kind: input, shape index: {}]   ;;  %s987_s0 = inlined_call_operand.vmem [shape: bf16[16,400], index: 0, kind: input, shape index: {}]   ;;  %s988_s3 = inlined_call_operand.vmem [shape: bf16[128,128], index: 3, kind: input, shape index: {}]   ;;  %s989_s5 = inlined_call_operand.vmem [shape: bf16[128,128], index: 5, kind: input, shape index: {}]   ;;  %s990_s2 = inlined_call_operand.vmem [shape: f32[1,128], index: 2, kind: input, shape index: {}]   ;;  %s991_s4 = inlined_call_operand.vmem [shape: f32[1,128], index: 4, kind: input, shape index: {}]   ;;  %s992_s6 = inlined_call_operand.vmem [shape: f32[1,128], index: 6, kind: input, shape index: {}]   ;;  %s993_s7 = inlined_call_operand.vmem [shape: f32[16,128], index: 7, kind: output, shape index: {}]  }
   0x1   :  { %302 = vmatprep.subr.bf16.mxu1 %v766_v0  ;;  %v711_v1 = vld [vmem:[%s986_s1 + $0x40] sm:$0xff]   ;;  %v714_v4 = vld [vmem:[%s986_s1 + $0x48] sm:$0xff]   ;;  %v717_v7 = vld [vmem:[%s986_s1 + $0x50] sm:$0xff]  }
   0x2   :  { %v712_v2 = vld [vmem:[%s986_s1 + $0x80] sm:$0xff]   ;;  %628 = vmatprep.subr.bf16.mxu0 %v711_v1  ;;  %v715_v5 = vld [vmem:[%s986_s1 + $0x88] sm:$0xff]   ;;  %v718_v8 = vld [vmem:[%s986_s1 + $0x90] sm:$0xff]  }
   0x3   :  { %v713_v3 = vld [vmem:[%s986_s1] sm:$0xff]   ;;  %303 = vmatpush1.bf16.msra.mxu1 %v712_v2  ;;  %v716_v6 = vld [vmem:[%s986_s1 + $0x8] sm:$0xff]   ;;  %v719_v9 = vld [vmem:[%s986_s1 + $0x10] sm:$0xff]  }
   0x4   :  { %629 = vmatpush3.bf16.msra.mxu0 %v713_v3  ;;  %304 = vmatprep.subr.bf16.mxu1 %v766_v0  ;;  %v720_v10 = vld [vmem:[%s986_s1 + $0x58] sm:$0xff]   ;;  %v723_v13 = vld [vmem:[%s986_s1 + $0x60] sm:$0xff]   ;;  %v726_v16 = vld [vmem:[%s986_s1 + $0x68] sm:$0xff]  }
   0x5   :  { %630 = vmatprep.subr.bf16.mxu0 %v714_v4  ;;  %v721_v11 = vld [vmem:[%s986_s1 + $0x98] sm:$0xff]   ;;  %v724_v14 = vld [vmem:[%s986_s1 + $0xa0] sm:$0xff]   ;;  %v727_v17 = vld [vmem:[%s986_s1 + $0xa8] sm:$0xff]  }
   0x6   :  { %v722_v12 = vld [vmem:[%s986_s1 + $0x18] sm:$0xff]   ;;  %v725_v15 = vld [vmem:[%s986_s1 + $0x20] sm:$0xff]   ;;  %v728_v18 = vld [vmem:[%s986_s1 + $0x28] sm:$0xff]  }
   0x7   :  { %305 = vmatpush1.bf16.msra.mxu1 %v715_v5  ;;  %v729_v19 = vld [vmem:[%s986_s1 + $0x70] sm:$0xff]   ;;  %v732_v22 = vld [vmem:[%s986_s1 + $0x78] sm:$0xff]   ;;  %v738_v28 = vld [vmem:[%s986_s1 + $0xc0] sm:$0xff]  }
   0x8   :  { %631 = vmatpush3.bf16.msra.mxu0 %v716_v6  ;;  %306 = vmatprep.subr.bf16.mxu1 %v766_v0  ;;  %v730_v20 = vld [vmem:[%s986_s1 + $0xb0] sm:$0xff]   ;;  %v733_v24 = vld [vmem:[%s986_s1 + $0xb8] sm:$0xff]   ;;  %v742_v29 = vld [vmem:[%s988_s3] sm:$0xff]  }
   0x9   :  { %632 = vmatprep.subr.bf16.mxu0 %v717_v7  ;;  %v731_v21 = vld [vmem:[%s986_s1 + $0x30] sm:$0xff]   ;;  %v741_v25 = vld [vmem:[%s987_s0 + $0xc] ss:$16 sps:$4 sm:$0xff]   ;;  %v739_v31 = vld [vmem:[%s987_s0 + $0x8] ss:$16 sps:$4 sm:$0xff]  }
   0xa   :  { %v737_v23 = vld [vmem:[%s987_s0 + $0x4] ss:$16 sps:$4 sm:$0xff]   ;;  %v734_v26 = vld [vmem:[%s986_s1 + $0x38] sm:$0xff]   ;;  %v735_v27 = vld [vmem:[%s987_s0] ss:$16 sps:$4 sm:$0xff]   ;;  %609 = vmatprep.mubr.msk.bf16.mxu1 %vm257_vm0, %v741_v25 }
   0xb   :  { %307 = vmatpush1.bf16.msra.mxu1 %v718_v8  ;;  %293 = vmatprep.mubr.bf16.mxu0 %v737_v23  ;;  %v743_v32 = vld [vmem:[%s988_s3 + $0x8] sm:$0xff]   ;;  %v744_v33 = vld [vmem:[%s988_s3 + $0x10] sm:$0xff]   ;;  %v745_v34 = vld [vmem:[%s988_s3 + $0x18] sm:$0xff]  }
   0xc   :  { %633 = vmatpush3.bf16.msra.mxu0 %v719_v9  ;;  %308 = vmatprep.subr.bf16.mxu1 %v766_v0  ;;  %v746_v35 = vld [vmem:[%s988_s3 + $0x20] sm:$0xff]   ;;  %v747_v36 = vld [vmem:[%s988_s3 + $0x28] sm:$0xff]   ;;  %v748_v37 = vld [vmem:[%s988_s3 + $0x30] sm:$0xff]  }
   0xd   :  { %634 = vmatprep.subr.bf16.mxu0 %v720_v10  ;;  %v749_v38 = vld [vmem:[%s988_s3 + $0x38] sm:$0xff]   ;;  %v750_v39 = vld [vmem:[%s989_s5] sm:$0xff]   ;;  %v751_v40 = vld [vmem:[%s989_s5 + $0x8] sm:$0xff]  }
   0xe   :  { %v752_v41 = vld [vmem:[%s989_s5 + $0x10] sm:$0xff]   ;;  %v753_v42 = vld [vmem:[%s989_s5 + $0x18] sm:$0xff]   ;;  %v579_v45 = vld [vmem:[%s990_s2] ss:$0 sm:$0xff] }
   0xf   :  { %309 = vmatpush1.bf16.msra.mxu1 %v721_v11  ;;  %v754_v61 = vld [vmem:[%s989_s5 + $0x20] sm:$0xff]   ;;  %v755_v62 = vld [vmem:[%s989_s5 + $0x28] sm:$0xff]   ;;  %v756_v63 = vld [vmem:[%s989_s5 + $0x30] sm:$0xff]  }
  0x10   :  { %635 = vmatpush3.bf16.msra.mxu0 %v722_v12  ;;  %310 = vmatprep.subr.bf16.mxu1 %v766_v0  ;;  %v610_v1 = vld [vmem:[%s991_s4] ss:$0 sm:$0xff] }
  0x11   :  { %636 = vmatprep.subr.bf16.mxu0 %v723_v13  ;;  %v619_v11 = vld [vmem:[%s992_s6] ss:$0 sm:$0xff] }
  0x13   :  { %311 = vmatpush1.bf16.msra.mxu1 %v724_v14 }
  0x14   :  { %637 = vmatpush3.bf16.msra.mxu0 %v725_v15  ;;  %312 = vmatprep.subr.bf16.mxu1 %v766_v0 }
  0x15   :  { %638 = vmatprep.subr.bf16.mxu0 %v726_v16 }
  0x17   :  { %313 = vmatpush1.bf16.msra.mxu1 %v727_v17 }
  0x18   :  { %639 = vmatpush3.bf16.msra.mxu0 %v728_v18  ;;  %314 = vmatprep.subr.bf16.mxu1 %v766_v0 }
  0x19   :  { %640 = vmatprep.subr.bf16.mxu0 %v729_v19 }
  0x1b   :  { %315 = vmatpush1.bf16.msra.mxu1 %v730_v20 }
  0x1c   :  { %641 = vmatpush3.bf16.msra.mxu0 %v731_v21  ;;  %316 = vmatprep.subr.bf16.mxu1 %v766_v0 }
  0x1d   :  { %642 = vmatprep.subr.bf16.mxu0 %v732_v22 }
  0x1f   :  { %317 = vmatpush1.bf16.msra.mxu1 %v733_v24 }
  0x20   :  { %643 = vmatpush3.bf16.msra.mxu0 %v734_v26  ;;  %318 = vmatprep.subr.bf16.mxu1 %v766_v0  ;;  %v757_v0 = vld [vmem:[%s989_s5 + $0x38] sm:$0xff]  }
  0x21   :  { %668 = vmatprep.subr.bf16.mxu0 %v767_v30 }
  0x23   :  { %294 = vmatmul.mubr.bf16.vlgmr.msra.gmra.mrb[0].mxu0 %v735_v27  ;;  %319 = vmatpush1.bf16.msra.mxu1 %v738_v28 }
  0x24   :  { %669 = vmatpush3.bf16.msra.mxu0 %v742_v29  ;;  %688 = vmatprep.subr.bf16.mxu1 %v767_v30 }
  0x25   :  { %670 = vmatprep.subr.bf16.mxu0 %v767_v30  ;;  %684 = vmatprep.mubr.msk.bf16.mxu0 %vm768_vm1, %v767_v30 }
  0x26   :  { %335 = vmatmul.mubr.bf16.vlgmr.msra.gmra.mrb[0].mxu1 %v739_v31 }
  0x27   :  { %704 = vmatprep.mubr.msk.bf16.mxu1 %vm768_vm1, %v767_v30  ;;  %689 = vmatpush3.bf16.msra.mxu1 %v750_v39 }
  0x28   :  { %671 = vmatpush3.bf16.msra.mxu0 %v743_v32  ;;  %690 = vmatprep.subr.bf16.mxu1 %v767_v30 }
  0x29   :  { %672 = vmatprep.subr.bf16.mxu0 %v767_v30 }
  0x2b   :  { %691 = vmatpush3.bf16.msra.mxu1 %v751_v40 }
  0x2c   :  { %673 = vmatpush3.bf16.msra.mxu0 %v744_v33  ;;  %692 = vmatprep.subr.bf16.mxu1 %v767_v30 }
  0x2d   :  { %674 = vmatprep.subr.bf16.mxu0 %v767_v30 }
  0x2f   :  { %693 = vmatpush3.bf16.msra.mxu1 %v752_v41 }
  0x30   :  { %675 = vmatpush3.bf16.msra.mxu0 %v745_v34  ;;  %694 = vmatprep.subr.bf16.mxu1 %v767_v30 }
  0x31   :  { %676 = vmatprep.subr.bf16.mxu0 %v767_v30 }
  0x33   :  { %695 = vmatpush3.bf16.msra.mxu1 %v753_v42 }
  0x34   :  { %677 = vmatpush3.bf16.msra.mxu0 %v746_v35  ;;  %696 = vmatprep.subr.bf16.mxu1 %v767_v30 }
  0x35   :  { %678 = vmatprep.subr.bf16.mxu0 %v767_v30 }
  0x37   :  { %697 = vmatpush3.bf16.msra.mxu1 %v754_v61 }
  0x38   :  { %679 = vmatpush3.bf16.msra.mxu0 %v747_v36  ;;  %698 = vmatprep.subr.bf16.mxu1 %v767_v30 }
  0x39   :  { %680 = vmatprep.subr.bf16.mxu0 %v767_v30 }
  0x3b   :  { %699 = vmatpush3.bf16.msra.mxu1 %v755_v62 }
  0x3c   :  { %681 = vmatpush3.bf16.msra.mxu0 %v748_v37  ;;  %700 = vmatprep.subr.bf16.mxu1 %v767_v30 }
  0x3d   :  { %682 = vmatprep.subr.bf16.mxu0 %v767_v30 }
  0x3f   :  { %701 = vmatpush3.bf16.msra.mxu1 %v756_v63 }
  0x40   :  { %683 = vmatpush3.bf16.msra.mxu0 %v749_v38  ;;  %702 = vmatprep.subr.bf16.mxu1 %v767_v30 }
  0x43   :  { %703 = vmatpush3.bf16.msra.mxu1 %v757_v0 }
  0xf6   :  { %v644_v43 = vpop.f32.mrb[0].mxu0 }
  0xf7   :  { %v645_v44 = vpop.f32.mrb[1].mxu0 }
  0xf8   :  { %v646_v46 = vadd.f32 %v645_v44, %v644_v43  ;;  %v647_v47 = vpop.f32.mrb[2].mxu0 }
  0xf9   :  { %v648_v48 = vpop.f32.mrb[3].mxu0  ;;  %v336_v49 = vpop.f32.mrb[0].mxu1 }
  0xfa   :  { %v649_v50 = vadd.f32 %v648_v48, %v647_v47  ;;  %v296_v51 = vadd.f32 %v646_v46, %v579_v45  ;;  %v338_v52 = vpop.f32.mrb[1].mxu1 }
  0xfb   :  { %v339_v53 = vpop.f32.mrb[2].mxu1 }
  0xfc   :  { %v337_v54 = vadd.f32 %v336_v49, %v296_v51  ;;  %v299_v55 = vadd.f32 %v649_v50, %v579_v45  ;;  %v341_v56 = vpop.f32.mrb[3].mxu1 }
  0xfe   :  { %v340_v57 = vadd.f32 %v339_v53, %v299_v55  ;;  %758 = vtanh.f32 %v337_v54 }
 0x100   :  { %760 = vtanh.f32 %v340_v57 }
 0x108   :  { %v759_v58 = vpop.eup %758 }
 0x10a   :  { %v761_v59 = vpop.eup %760 }
 0x10b   :  { %v345_v60 = vpack.c.bf16 %v761_v59, %v759_v58 }
 0x10d   :  { %685 = vmatmul.mubr.bf16.vlgmr.msra.gmra.mrb[4].mxu0 %v345_v60 }
 0x1e0   :  { %v451_v2 = vpop.f32.mrb[4].mxu0 }
 0x1e1   :  { %v452_v3 = vadd.f32 %v610_v1, %v451_v2  ;;  %v686_v4 = vpop.f32.mrb[5].mxu0 }
 0x1e2   :  { %v454_v5 = vpop.f32.mrb[6].mxu0 }
 0x1e3   :  { %v455_v6 = vadd.f32 %v610_v1, %v454_v5  ;;  %v687_v7 = vpop.f32.mrb[7].mxu0  ;;  %762 = vtanh.f32 %v452_v3 }
 0x1e5   :  { %764 = vtanh.f32 %v455_v6 }
 0x1ed   :  { %v763_v8 = vpop.eup %762 }
 0x1ef   :  { %v765_v9 = vpop.eup %764 }
 0x1f0   :  { %v460_v10 = vpack.c.bf16 %v765_v9, %v763_v8 }
 0x1f2   :  { %705 = vmatmul.mubr.bf16.vlgmr.msra.gmra.mrb[4].mxu1 %v460_v10 }
 0x2c5   :  { %v566_v12 = vpop.f32.mrb[4].mxu1 }
 0x2c6   :  { %v567_v13 = vadd.f32 %v619_v11, %v566_v12  ;;  %v706_v14 = vpop.f32.mrb[5].mxu1 }
 0x2c7   :  { %v569_v15 = vpop.f32.mrb[6].mxu1 }
 0x2c8   :  { %573 = vst [vmem:[%s993_s7] sm:$0xff] %v567_v13  ;;  %v570_v16 = vadd.f32 %v619_v11, %v569_v15  ;;  %v707_v17 = vpop.f32.mrb[7].mxu1 }
 0x2ca   :  { %574 = vst [vmem:[%s993_s7 + $0x8] sm:$0xff] %v570_v16 }

</bundles_post_ra>
